<compile_context>
chip_gen: v5e
topology: v5e:2x2
jax: 0.10.0
libtpu: 0.0.40
codegen_flags: <defaults>
</compile_context>

<pallas_src>
import jax
import jax.numpy as jnp
from jax.experimental import pallas as pl
from jax.experimental.pallas import tpu as pltpu

KERNEL_SIZES = (3, 4, 5)


def textcnn_kernel(x_ref, w_ref, mask_ref, wl_ref, bl_ref, out_ref):
    """Fused im2col conv (one MXU matmul) + masked global max-pool + linear.

    x_ref   : (TB, Lm, D)  bf16  im2col slab (D = ks_max*E), position-padded
    w_ref   : (D, NF)      bf16  fused conv weights (taps zero-padded, filters
                                 of all branches concatenated along columns)
    mask_ref: (Lm, NF)     f32   0 for valid conv positions, -1e30 otherwise
    wl_ref  : (NF, 2)      f32   linear weight (transposed)
    bl_ref  : (1, 2)       f32   linear bias with conv bias folded in
    out_ref : (TB, 2)      f32   logits
    """
    x = x_ref[...]                                        # (TB, Lm, D)
    TB, Lm, D = x.shape
    NF = w_ref.shape[1]

    # All three conv branches in one matmul (K = ks_max*E = 160).
    y = jnp.dot(x.reshape(TB * Lm, D), w_ref[...],
                preferred_element_type=jnp.float32)       # (TB*Lm, NF) f32
    y = y.reshape(TB, Lm, NF) + mask_ref[...][None, :, :]

    # Global max over conv positions == MaxPool1d(L - ks + 1) per branch.
    pooled = jnp.max(y, axis=1)                           # (TB, NF) f32

    out_ref[...] = (jnp.dot(pooled, wl_ref[...],
                            preferred_element_type=jnp.float32)
                    + bl_ref[...])                        # (TB, 2)


def init_params(key, n_terms, embed_size, n_filters, kernel_sizes):
    keys = jax.random.split(key, 3 + len(kernel_sizes))
    params = {
        "embedding": 0.1 * jax.random.normal(
            keys[0], (n_terms, embed_size), jnp.float32),
        "conv_w": [
            0.1 * jax.random.normal(
                keys[3 + i], (ks, embed_size, n_filters), jnp.float32)
            for i, ks in enumerate(kernel_sizes)
        ],
        "conv_b": 0.05 * jax.random.normal(
            keys[1], (len(kernel_sizes), n_filters), jnp.float32),
        "lin_w": 0.1 * jax.random.normal(
            keys[2], (len(kernel_sizes) * n_filters, 2), jnp.float32),
        "lin_b": jnp.zeros((1, 2), jnp.float32),
    }
    return params


def textcnn_forward(token_ids, params, kernel_sizes=KERNEL_SIZES):
    if token_ids.ndim == 1:                 # mirrors the x.dim() == 1 unsqueeze
        token_ids = token_ids[None, :]
    B, L = token_ids.shape
    embedding = params["embedding"]
    E = embedding.shape[1]
    F = params["conv_w"][0].shape[-1]
    NK = len(kernel_sizes)
    NF = NK * F
    ks_max = max(kernel_sizes)
    ks_min = min(kernel_sizes)
    Lout_max = L - ks_min + 1
    Lm = ((Lout_max + 7) // 8) * 8          # sublane-align the position axis
    D = ks_max * E

    # Embedding gather (data-dependent) + one-time im2col unfold in the wrapper.
    # TODO(synk): fuse the embedding gather into the kernel (scalar-prefetch +
    #             row gather) to avoid materializing the slab in HBM.
    emb = embedding[token_ids].astype(jnp.float32)                   # (B, L, E)
    emb = jnp.pad(emb, ((0, 0), (0, ks_max - 1), (0, 0)))            # zero tail
    slab = jnp.concatenate(
        [emb[:, d:d + Lout_max, :] for d in range(ks_max)], axis=-1)  # (B,Lout,D)
    slab = jnp.pad(slab, ((0, 0), (0, Lm - Lout_max), (0, 0)))        # (B,Lm,D)

    # Batch tiling for the pipelined grid.
    TB = B if B <= 256 else 256
    B_pad = ((B + TB - 1) // TB) * TB
    if B_pad != B:
        slab = jnp.pad(slab, ((0, B_pad - B), (0, 0), (0, 0)))
    slab = slab.astype(jnp.bfloat16)

    # Fused conv weight: zero-pad each branch to ks_max taps, flatten, concat
    # filters -> (D, NF).  Branch/filter order matches PyTorch's cat(dim=1).
    cols = []
    for w in params["conv_w"]:
        ks = w.shape[0]
        wpad = jnp.pad(w, ((0, ks_max - ks), (0, 0), (0, 0)))
        cols.append(wpad.reshape(D, F))
    w_big = jnp.concatenate(cols, axis=1).astype(jnp.bfloat16)        # (D, NF)

    # Validity mask: branch i only has L - ks_i + 1 valid conv positions.
    pos = jnp.arange(Lm)[:, None]
    mask = jnp.concatenate(
        [jnp.where(pos < (L - ks + 1), 0.0, -1e30) * jnp.ones((1, F))
         for ks in kernel_sizes], axis=1).astype(jnp.float32)         # (Lm, NF)

    # Fold conv bias into linear bias: max(conv)+b == max(conv+b).
    wl = params["lin_w"].astype(jnp.float32)                          # (NF, 2)
    bl = (params["lin_b"]
          + params["conv_b"].reshape(1, NF) @ params["lin_w"]).astype(jnp.float32)

    out = pl.pallas_call(
        textcnn_kernel,
        out_shape=jax.ShapeDtypeStruct((B_pad, 2), jnp.float32),
        grid=(B_pad // TB,),
        in_specs=[
            pl.BlockSpec((TB, Lm, D), lambda b: (b, 0, 0)),   # batch-tiled slab
            pl.BlockSpec((D, NF), lambda b: (0, 0)),          # resident weights
            pl.BlockSpec((Lm, NF), lambda b: (0, 0)),
            pl.BlockSpec((NF, 2), lambda b: (0, 0)),
            pl.BlockSpec((1, 2), lambda b: (0, 0)),
        ],
        out_specs=pl.BlockSpec((TB, 2), lambda b: (b, 0)),
        compiler_params=pltpu.CompilerParams(
            dimension_semantics=("parallel",)),
    )(slab, w_big, mask, wl, bl)
    return out[:B]


def textcnn_reference(token_ids, params, kernel_sizes=KERNEL_SIZES):
    """Pure-JAX f32 reference with the original per-branch math."""
    if token_ids.ndim == 1:
        token_ids = token_ids[None, :]
    emb = params["embedding"][token_ids].astype(jnp.float32)   # (B, L, E)
    B, L, E = emb.shape
    pooled = []
    for i, w in enumerate(params["conv_w"]):
        ks, _, F = w.shape
        Lout = L - ks + 1
        acc = jnp.zeros((B, Lout, F), jnp.float32)
        for d in range(ks):
            acc += jnp.einsum("ble,ef->blf", emb[:, d:d + Lout, :], w[d])
        acc += params["conv_b"][i][None, None, :]
        pooled.append(jnp.max(acc, axis=1))
    feats = jnp.concatenate(pooled, axis=-1)
    return feats @ params["lin_w"] + params["lin_b"]


if __name__ == "__main__":
    key = jax.random.PRNGKey(0)
    k_tok, k_par = jax.random.split(key)

    B, L = 2, 16            # batch, sequence_len
    n_terms = 50
    embed_size = 32
    n_filters = 8

    params = init_params(k_par, n_terms, embed_size, n_filters, KERNEL_SIZES)
    x = jax.random.randint(k_tok, (B, L), 0, n_terms, dtype=jnp.int32)

    logits = textcnn_forward(x, params)
    jax.block_until_ready(logits)

    ref = textcnn_reference(x, params)
    assert logits.shape == (B, 2)
    # bf16 activations/weights in the kernel vs. f32 reference -> loose tol.
    assert jnp.allclose(logits, ref, rtol=2e-2, atol=2e-2)

    print("KERNEL_OK")
</pallas_src>

<mosaic_0001>
module attributes {stable_mosaic.version = 11 : i64} {
  func.func @textcnn_kernel(%arg0: i32, %arg1: memref<2x16x160xbf16, #tpu.memory_space<vmem>>, %arg2: memref<160x24xbf16, #tpu.memory_space<vmem>>, %arg3: memref<16x24xf32, #tpu.memory_space<vmem>>, %arg4: memref<24x2xf32, #tpu.memory_space<vmem>>, %arg5: memref<1x2xf32, #tpu.memory_space<vmem>>, %arg6: memref<2x2xf32, #tpu.memory_space<vmem>>) attributes {dimension_semantics = [#tpu.dimension_semantics<parallel>], iteration_bounds = array<i64: 1>, scalar_prefetch = 0 : i64, scratch_operands = 0 : i64, tpu.core_type = #tpu.core_type<tc>, window_params = [{transform_indices = @transform_0, window_bounds = array<i64: 2, 16, 160>}, {pipeline_mode = #tpu.pipeline_mode<synchronous>, transform_indices = @transform_1, window_bounds = array<i64: 160, 24>}, {pipeline_mode = #tpu.pipeline_mode<synchronous>, transform_indices = @transform_2, window_bounds = array<i64: 16, 24>}, {pipeline_mode = #tpu.pipeline_mode<synchronous>, transform_indices = @transform_3, window_bounds = array<i64: 24, 2>}, {pipeline_mode = #tpu.pipeline_mode<synchronous>, transform_indices = @transform_4, window_bounds = array<i64: 1, 2>}, {transform_indices = @transform_5, window_bounds = array<i64: 2, 2>}]} {
    %c0 = arith.constant 0 : index
    %c0_0 = arith.constant 0 : index
    %c0_1 = arith.constant 0 : index
    %0 = vector.load %arg1[%c0, %c0_0, %c0_1] : memref<2x16x160xbf16, #tpu.memory_space<vmem>>, vector<2x16x160xbf16>
    %1 = vector.shape_cast %0 : vector<2x16x160xbf16> to vector<32x160xbf16>
    %c0_2 = arith.constant 0 : index
    %c0_3 = arith.constant 0 : index
    %2 = vector.load %arg2[%c0_2, %c0_3] : memref<160x24xbf16, #tpu.memory_space<vmem>>, vector<160x24xbf16>
    %cst = arith.constant dense<0.000000e+00> : vector<32x24xf32>
    %3 = tpu.matmul %1, %2, %cst {dimension_numbers = #tpu.dot_dimension_numbers<[1], [0], [0], [1], [0, 0, 1, 1], [], []>} : vector<32x160xbf16>, vector<160x24xbf16>, vector<32x24xf32> -> vector<32x24xf32>
    %4 = vector.shape_cast %3 : vector<32x24xf32> to vector<2x16x24xf32>
    %c0_4 = arith.constant 0 : index
    %c0_5 = arith.constant 0 : index
    %5 = vector.load %arg3[%c0_4, %c0_5] : memref<16x24xf32, #tpu.memory_space<vmem>>, vector<16x24xf32>
    %6 = vector.shape_cast %5 : vector<16x24xf32> to vector<1x16x24xf32>
    %7 = vector.broadcast %6 : vector<1x16x24xf32> to vector<2x16x24xf32>
    %8 = arith.addf %4, %7 : vector<2x16x24xf32>
    %cst_6 = arith.constant dense<0xFF800000> : vector<2x24xf32>
    %9 = vector.multi_reduction <maximumf>, %8, %cst_6 [1] : vector<2x16x24xf32> to vector<2x24xf32>
    %c0_7 = arith.constant 0 : index
    %c0_8 = arith.constant 0 : index
    %10 = vector.load %arg4[%c0_7, %c0_8] : memref<24x2xf32, #tpu.memory_space<vmem>>, vector<24x2xf32>
    %cst_9 = arith.constant dense<0.000000e+00> : vector<2x2xf32>
    %11 = tpu.matmul %9, %10, %cst_9 {dimension_numbers = #tpu.dot_dimension_numbers<[1], [0], [0], [1], [0, 0, 1, 1], [], []>} : vector<2x24xf32>, vector<24x2xf32>, vector<2x2xf32> -> vector<2x2xf32>
    %c0_10 = arith.constant 0 : index
    %c0_11 = arith.constant 0 : index
    %12 = vector.load %arg5[%c0_10, %c0_11] : memref<1x2xf32, #tpu.memory_space<vmem>>, vector<1x2xf32>
    %13 = vector.broadcast %12 : vector<1x2xf32> to vector<2x2xf32>
    %14 = arith.addf %11, %13 : vector<2x2xf32>
    %c0_12 = arith.constant 0 : index
    %c0_13 = arith.constant 0 : index
    %15 = vector.load %arg6[%c0_12, %c0_13] : memref<2x2xf32, #tpu.memory_space<vmem>>, vector<2x2xf32>
    tpu.vector_store %arg6[%c0_12, %c0_13], %14 {strides = array<i32>} : memref<2x2xf32, #tpu.memory_space<vmem>>, vector<2x2xf32>,
    return
  }
  func.func @transform_0(%arg0: i32) -> (i32, i32, i32) {
    %c0_i32 = arith.constant 0 : i32
    %c0_i32_0 = arith.constant 0 : i32
    %c0_i32_1 = arith.constant 0 : i32
    return %arg0, %c0_i32, %c0_i32_0 : i32, i32, i32
  }
  func.func @transform_1(%arg0: i32) -> (i32, i32) {
    %c0_i32 = arith.constant 0 : i32
    %c0_i32_0 = arith.constant 0 : i32
    %c0_i32_1 = arith.constant 0 : i32
    return %c0_i32, %c0_i32_0 : i32, i32
  }
  func.func @transform_2(%arg0: i32) -> (i32, i32) {
    %c0_i32 = arith.constant 0 : i32
    %c0_i32_0 = arith.constant 0 : i32
    %c0_i32_1 = arith.constant 0 : i32
    return %c0_i32, %c0_i32_0 : i32, i32
  }
  func.func @transform_3(%arg0: i32) -> (i32, i32) {
    %c0_i32 = arith.constant 0 : i32
    %c0_i32_0 = arith.constant 0 : i32
    %c0_i32_1 = arith.constant 0 : i32
    return %c0_i32, %c0_i32_0 : i32, i32
  }
  func.func @transform_4(%arg0: i32) -> (i32, i32) {
    %c0_i32 = arith.constant 0 : i32
    %c0_i32_0 = arith.constant 0 : i32
    %c0_i32_1 = arith.constant 0 : i32
    return %c0_i32, %c0_i32_0 : i32, i32
  }
  func.func @transform_5(%arg0: i32) -> (i32, i32) {
    %c0_i32 = arith.constant 0 : i32
    %c0_i32_0 = arith.constant 0 : i32
    return %arg0, %c0_i32 : i32, i32
  }
}

</mosaic_0001>

<bundles_post_ra>
// kernel: tpu_custom_call.1
= control target key start
LH: loop header
LB: loop body
LE: loop exit
PB: predicated region body
PF: predicated region fallthrough
CT: control target
= control target key end

     0   :  { %s467_s0 = inlined_call_operand.vmem [shape: bf16[2,16,160], index: 0, kind: input, shape index: {}]   ;;  %s468_s1 = inlined_call_operand.vmem [shape: bf16[160,24], index: 1, kind: input, shape index: {}]   ;;  %s469_s2 = inlined_call_operand.vmem [shape: f32[16,24], index: 2, kind: input, shape index: {}]   ;;  %s470_s3 = inlined_call_operand.vmem [shape: f32[24,2], index: 3, kind: input, shape index: {}]   ;;  %s471_s4 = inlined_call_operand.vmem [shape: f32[1,2], index: 4, kind: input, shape index: {}]   ;;  %s472_s5 = inlined_call_operand.hbm [shape: f32[2,2], index: 5, kind: output, shape index: {}]  }
   0x1   :  { %v315_v0 = vld [vmem:[%s468_s1 + $0x38] sm:$0xff]  ;;  %v317_v1 = vld [vmem:[%s468_s1 + $0x48] sm:$0xff]  ;;  %v314_v2 = vld [vmem:[%s468_s1 + $0x30] sm:$0xff] }
   0x2   :  { %131 = vmatpush.bf16.msra.mxu0 %v315_v0  ;;  %318 = vmatpush.bf16.msra.mxu3 %v315_v0  ;;  %v316_v3 = vld [vmem:[%s468_s1 + $0x40] sm:$0xff]  ;;  %v249_v5 = vld [vmem:[%s467_s0 + $0x8] sm:$0xf0] }
   0x3   :  { %156 = vmatpush.bf16.msra.mxu1 %v317_v1  ;;  %v304_v4 = vld [vmem:[%s467_s0 + $0x4] sm:$0xf]  ;;  %v313_v6 = vld [vmem:[%s468_s1 + $0x28] sm:$0xff] }
   0x6   :  { %132 = vmatpush.bf16.msra.mxu0 %v314_v2  ;;  %319 = vmatpush.bf16.msra.mxu3 %v314_v2 }
   0x7   :  { %10 = vsyncpa [#allocation3], 0  ;;  %157 = vmatpush.bf16.msra.mxu1 %v316_v3  ;;  %v252_v7 = vor.u32 %v304_v4, %v249_v5  ;;  %vm124_vm0 = vcmask 261120   ;;  %v312_v8 = vld [vmem:[%s468_s1 + $0x20] sm:$0xff]  ;;  %v311_v9 = vld [vmem:[%s468_s1 + $0x18] sm:$0xff]  ;;  %vm175_vm1 = vcmask 195584  }
   0x8   :  { %v310_v10 = vld [vmem:[%s468_s1 + $0x10] sm:$0xff]  ;;  %v257_v12 = vld [vmem:[%s467_s0 + $0x18] sm:$0xf0]  ;;  %v309_v13 = vld [vmem:[%s468_s1 + $0x8] sm:$0xff]  ;;  %vm203_vm2 = vcmask 1041409   ;;  %s354_s12 = smov [#allocation2]  }
   0x9   :  { %v306_v11 = vld [vmem:[%s467_s0 + $0x14] sm:$0xf]  ;;  %v308_v15 = vld [vmem:[%s468_s1] sm:$0xff]  ;;  %v305_v17 = vld [vmem:[%s467_s0 + $0x4] sm:$0xf0]  ;;  %s234_s13 = sshll.u32 %s354_s12, 4  ;;  %s235_s13 = int_to_ptr.vmem [resolvable:$true] %s234_s13 }
   0xa   :  { %133 = vmatpush.bf16.msra.mxu0 %v313_v6  ;;  %320 = vmatpush.bf16.msra.mxu3 %v313_v6  ;;  %v260_v14 = vor.u32 %v306_v11, %v257_v12  ;;  %v247_v16 = vld [vmem:[%s467_s0] sm:$0xf]  ;;  %v255_v18 = vld [vmem:[%s467_s0 + $0x10] sm:$0xf]  ;;  %v307_v19 = vld [vmem:[%s467_s0 + $0x14] sm:$0xf0] }
   0xb   :  { %301 = vmatmul.msk.bf16.vlgmr.msra.gmra.mxu1 %vm124_vm0, %v252_v7  ;;  %v248_v20 = vor.u32 %v305_v17, %v247_v16  ;;  %v256_v21 = vor.u32 %v307_v19, %v255_v18  ;;  %v196_v24 = vld [vmem:[%s470_s3 + $0x10] sm:$0xff]  ;;  %v195_v25 = vld [vmem:[%s470_s3 + $0x8] sm:$0xff]  ;;  %v194_v26 = vld [vmem:[%s470_s3] sm:$0xff]  ;;  %s236_s16 = sshll.u32 %s472_s5, 4  ;;  %vm227_vm3 = vcmask 9216   ;;  %s237_s16 = int_to_ptr.hbm [resolvable:$true] %s236_s16 }
   0xc   :  { %220 = vmatpush.msra.mxu2 %v196_v24  ;;  %v169_v30 = vld [vmem:[%s469_s2] sm:$0xff]  ;;  %v170_v33 = vld [vmem:[%s469_s2 + $0x8] sm:$0xff] }
   0xd   :  { %v327_v62 = vld [vmem:[%s471_s4] ss:$0 sm:$0xff] }
   0xe   :  { %134 = vmatpush.bf16.msra.mxu0 %v312_v8  ;;  %321 = vmatpush.bf16.msra.mxu3 %v312_v8 }
   0xf   :  { %221 = vmatpush.msra.mxu2 %v195_v25 }
  0x11   :  { %222 = vmatpush.msra.mxu2 %v194_v26 }
  0x12   :  { %135 = vmatpush.bf16.msra.mxu0 %v311_v9  ;;  %322 = vmatpush.bf16.msra.mxu3 %v311_v9 }
  0x16   :  { %136 = vmatpush.bf16.msra.mxu0 %v310_v10  ;;  %323 = vmatpush.bf16.msra.mxu3 %v310_v10 }
  0x1a   :  { %137 = vmatpush.bf16.msra.mxu0 %v309_v13  ;;  %324 = vmatpush.bf16.msra.mxu3 %v309_v13 }
  0x1b   :  { %302 = vmatmul.msk.bf16.gmra.mxu1 %vm124_vm0, %v260_v14 }
  0x1e   :  { %138 = vmatpush.bf16.msra.mxu0 %v308_v15  ;;  %325 = vmatpush.bf16.msra.mxu3 %v308_v15 }
  0x21   :  { %139 = vmatmul.bf16.vlgmr.msra.gmra.mxu0 %v248_v20  ;;  %144 = vmatmul.bf16.vlgmr.msra.gmra.mxu3 %v256_v21 }
  0x88   :  { %v159_v22 = vpop.f32.mrf.mxu1 }
  0x90   :  { %v161_v23 = vpop.f32.mrf.mxu1 }
  0x98   :  { %v164_v28 = vpop.f32.mrf.mxu1 }
  0x9e   :  { %v140_v27 = vpop.f32.mrf.mxu0 }
  0x9f   :  { %v160_v29 = vadd.f32 %v159_v22, %v140_v27 }
  0xa0   :  { %v166_v40 = vpop.f32.mrf.mxu1 }
  0xa1   :  { %v171_v34 = vadd.f32 %v169_v30, %v160_v29 }
  0xa3   :  { %v176_v38 = vsel %vm175_vm1, %v171_v34, -inf }
  0xa4   :  { %v145_v31 = vpop.f32.mrf.mxu3 }
  0xa5   :  { %v165_v36 = vadd.f32 %v164_v28, %v145_v31 }
  0xa6   :  { %v142_v32 = vpop.f32.mrf.mxu0 }
  0xa7   :  { %v162_v35 = vadd.f32 %v161_v23, %v142_v32  ;;  %v173_v43 = vadd.f32 %v169_v30, %v165_v36 }
  0xa9   :  { %v172_v37 = vadd.f32 %v170_v33, %v162_v35  ;;  %v185_v48 = vsel %vm175_vm1, %v173_v43, -inf }
  0xab   :  { %v177_v39 = vsel %vm175_vm1, %v172_v37, -inf }
  0xac   :  { %v178_v41 = vmax.f32 %v176_v38, %v177_v39  ;;  %v147_v42 = vpop.f32.mrf.mxu3 }
  0xad   :  { %v167_v44 = vadd.f32 %v166_v40, %v147_v42 }
  0xae   :  { %v179_v45 = vrot.slane %v178_v41, 4 }
  0xaf   :  { %v174_v46 = vadd.f32 %v170_v33, %v167_v44 }
  0xb0   :  { %v180_v47 = vmax.f32 %v178_v41, %v179_v45 }
  0xb1   :  { %v186_v49 = vsel %vm175_vm1, %v174_v46, -inf }
  0xb2   :  { %v181_v50 = vrot.slane %v180_v47, 2  ;;  %v187_v51 = vmax.f32 %v185_v48, %v186_v49 }
  0xb4   :  { %v188_v52 = vrot.slane %v187_v51, 4  ;;  %v182_v54 = vmax.f32 %v180_v47, %v181_v50 }
  0xb6   :  { %v189_v53 = vmax.f32 %v187_v51, %v188_v52  ;;  %v183_v56 = vrot.slane %v182_v54, 1 }
  0xb8   :  { %v190_v55 = vrot.slane %v189_v53, 2  ;;  %v184_v59 = vmax.f32 %v182_v54, %v183_v56 }
  0xba   :  { %v191_v57 = vmax.f32 %v189_v53, %v190_v55 }
  0xbc   :  { %v192_v58 = vrot.slane %v191_v57, 1 }
  0xbe   :  { %v193_v60 = vmax.f32 %v191_v57, %v192_v58 }
  0xc0   :  { %v204_v61 = vsel %vm203_vm2, %v193_v60, %v184_v59 }
  0xc1   :  { %303 = vmatmul.msk.f32.vlgmr.msra.gmra.mxu2 %vm175_vm1, %v204_v61 }
 0x144   :  { %v224_v63 = vpop.f32.mrf.mxu2 }
 0x145   :  { %v225_v0 = vadd.f32 %v327_v62, %v224_v63 }
 0x147   :  { %228 = vst.msk [vmem:[#allocation2] sm:$0x3] %vm227_vm3, %v225_v0 }
 0x148   :  { %239 = dma.vmem_to_hbm [thread:$0]  %s235_s13, 32, %s237_s16, [#allocation3]  }
 0x149   :  { %352 = dma.done.wait [#allocation3], 32  }
 0x14a   :  { %353 = vsyncadd [#allocation3], 4294967264 }
 0x14b   :  { %244 = vsyncpa [#allocation3], 1 }

</bundles_post_ra>
